<compile_context>
chip_gen: v7x
topology: tpu7x:2x2x1
jax: 0.10.0
libtpu: 0.0.40
codegen_flags: <defaults>
</compile_context>

<pallas_src>
import jax
import jax.numpy as jnp
import numpy as np
from jax.experimental import pallas as pl
from jax.experimental.pallas import tpu as pltpu


def _make_basic_block_kernel(H, W):
    S = H * W

    def kernel(x_ref, m_ref, w1_ref, b1_ref, w2_ref, b2_ref, out_ref):
        # x_ref : (1, C, S)  one batch element, NCHW with H*W flattened (lanes = S)
        # m_ref : (9, 1, S)  per-tap border masks (1.0 = source pixel in-bounds)
        # w1_ref: (9, P, C)  conv1 weights, tap-major (tap = (dh+1)*3 + (dw+1))
        # b1_ref: (P, 1)
        # w2_ref: (9, P, P)  conv2 weights, tap-major
        # b2_ref: (P, 1)
        # out_ref: (1, P, S)
        x = x_ref[0]  # (C, S)

        def conv3x3(inp, w_ref):
            acc = None
            for dh in (-1, 0, 1):
                for dw in (-1, 0, 1):
                    tap = (dh + 1) * 3 + (dw + 1)
                    k = dh * W + dw  # flattened source offset
                    if k == 0:
                        patch = inp
                    else:
                        # out[s] needs inp[s + k]  ->  roll by (-k) mod S (XLU)
                        patch = pltpu.roll(inp, (-k) % S, axis=1)
                        # zero contributions whose source pixel lies outside
                        # the image -- this *is* the conv's padding=1.
                        patch = patch * m_ref[tap]
                    t = jnp.dot(w_ref[tap], patch,
                                preferred_element_type=jnp.float32)
                    acc = t if acc is None else acc + t
            return acc

        mid = jnp.maximum(conv3x3(x, w1_ref) + b1_ref[...], 0.0)   # (P, S)
        out = conv3x3(mid, w2_ref) + b2_ref[...] + x               # residual (C == P)
        out_ref[0] = jnp.maximum(out, 0.0)

    return kernel


def _border_masks(H, W):
    """(9, 1, H*W) f32: masks[tap, 0, s] == 1 iff that tap's source pixel is in-bounds."""
    S = H * W
    row = np.repeat(np.arange(H), W)
    col = np.tile(np.arange(W), H)
    m = np.ones((9, 1, S), np.float32)
    for dh in (-1, 0, 1):
        for dw in (-1, 0, 1):
            tap = (dh + 1) * 3 + (dw + 1)
            valid = ((row + dh >= 0) & (row + dh < H) &
                     (col + dw >= 0) & (col + dw < W))
            m[tap, 0, :] = valid.astype(np.float32)
    return m


@jax.jit
def basic_block(x_nchw, w1_oihw, b1, w2_oihw, b2):
    """x: (N, C, H, W) float32; weights in PyTorch OIHW; returns NCHW."""
    N, C, H, W = x_nchw.shape
    P = w1_oihw.shape[0]
    assert C == P, "BasicBlock residual add requires inplanes == planes"
    S = H * W

    # Pure reshapes / tiny weight re-layouts only: no pad, no activation transpose.
    x_flat = x_nchw.reshape(N, C, S).astype(jnp.float32)
    masks = jnp.asarray(_border_masks(H, W))
    w1_t = jnp.transpose(w1_oihw, (2, 3, 0, 1)).reshape(9, P, C).astype(jnp.float32)
    w2_t = jnp.transpose(w2_oihw, (2, 3, 0, 1)).reshape(9, P, P).astype(jnp.float32)
    b1_c = b1.reshape(P, 1).astype(jnp.float32)
    b2_c = b2.reshape(P, 1).astype(jnp.float32)

    out_flat = pl.pallas_call(
        _make_basic_block_kernel(H, W),
        out_shape=jax.ShapeDtypeStruct((N, P, S), jnp.float32),
        grid_spec=pltpu.PrefetchScalarGridSpec(
            num_scalar_prefetch=0,
            grid=(N,),
            in_specs=[
                pl.BlockSpec((1, C, S), lambda n: (n, 0, 0)),
                pl.BlockSpec((9, 1, S), lambda n: (0, 0, 0)),
                pl.BlockSpec((9, P, C), lambda n: (0, 0, 0)),
                pl.BlockSpec((P, 1), lambda n: (0, 0)),
                pl.BlockSpec((9, P, P), lambda n: (0, 0, 0)),
                pl.BlockSpec((P, 1), lambda n: (0, 0)),
            ],
            out_specs=pl.BlockSpec((1, P, S), lambda n: (n, 0, 0)),
        ),
        compiler_params=pltpu.CompilerParams(
            dimension_semantics=("parallel",)),
    )(x_flat, masks, w1_t, b1_c, w2_t, b2_c)

    return out_flat.reshape(N, P, H, W)


def ref_basic_block(x, w1, b1, w2, b2):
    """Pure-JAX reference (NCHW / OIHW), matching the PyTorch module."""
    dn = ('NCHW', 'OIHW', 'NCHW')
    out = jax.lax.conv_general_dilated(
        x, w1, (1, 1), ((1, 1), (1, 1)), dimension_numbers=dn)
    out = out + b1[None, :, None, None]
    out = jnp.maximum(out, 0.0)
    out = jax.lax.conv_general_dilated(
        out, w2, (1, 1), ((1, 1), (1, 1)), dimension_numbers=dn)
    out = out + b2[None, :, None, None]
    out = out + x
    return jnp.maximum(out, 0.0)


if __name__ == "__main__":
    # Small shapes consistent with BasicBlock(inplanes=4, planes=4)
    N, C, H, W = 2, 4, 16, 16
    inplanes = planes = C

    key = jax.random.PRNGKey(0)
    kx, kw1, kb1, kw2, kb2 = jax.random.split(key, 5)

    x = jax.random.normal(kx, (N, C, H, W), dtype=jnp.float32)

    # Deterministic torch-like uniform(-1/sqrt(fan_in), 1/sqrt(fan_in)) init
    fan_in1 = inplanes * 3 * 3
    k1 = 1.0 / jnp.sqrt(fan_in1)
    w1 = jax.random.uniform(kw1, (planes, inplanes, 3, 3), jnp.float32, -k1, k1)
    b1 = jax.random.uniform(kb1, (planes,), jnp.float32, -k1, k1)

    fan_in2 = planes * 3 * 3
    k2 = 1.0 / jnp.sqrt(fan_in2)
    w2 = jax.random.uniform(kw2, (planes, planes, 3, 3), jnp.float32, -k2, k2)
    b2 = jax.random.uniform(kb2, (planes,), jnp.float32, -k2, k2)

    out = jax.block_until_ready(basic_block(x, w1, b1, w2, b2))
    ref = jax.block_until_ready(ref_basic_block(x, w1, b1, w2, b2))

    assert out.shape == (N, C, H, W), out.shape
    assert jnp.allclose(out, ref, atol=1e-4, rtol=1e-4), float(
        jnp.max(jnp.abs(out - ref)))

    print("KERNEL_OK")
</pallas_src>

<mosaic_0001>
module attributes {stable_mosaic.version = 11 : i64} {
  func.func @kernel(%arg0: i32, %arg1: memref<1x4x256xf32, #tpu.memory_space<vmem>>, %arg2: memref<9x1x256xf32, #tpu.memory_space<vmem>>, %arg3: memref<9x4x4xf32, #tpu.memory_space<vmem>>, %arg4: memref<4x1xf32, #tpu.memory_space<vmem>>, %arg5: memref<9x4x4xf32, #tpu.memory_space<vmem>>, %arg6: memref<4x1xf32, #tpu.memory_space<vmem>>, %arg7: memref<1x4x256xf32, #tpu.memory_space<vmem>>) attributes {dimension_semantics = [#tpu.dimension_semantics<parallel>], iteration_bounds = array<i64: 2>, scalar_prefetch = 0 : i64, scratch_operands = 0 : i64, tpu.core_type = #tpu.core_type<tc>, window_params = [{transform_indices = @transform_0, window_bounds = array<i64: 1, 4, 256>}, {pipeline_mode = #tpu.pipeline_mode<synchronous>, transform_indices = @transform_1, window_bounds = array<i64: 9, 1, 256>}, {pipeline_mode = #tpu.pipeline_mode<synchronous>, transform_indices = @transform_2, window_bounds = array<i64: 9, 4, 4>}, {pipeline_mode = #tpu.pipeline_mode<synchronous>, transform_indices = @transform_3, window_bounds = array<i64: 4, 1>}, {pipeline_mode = #tpu.pipeline_mode<synchronous>, transform_indices = @transform_4, window_bounds = array<i64: 9, 4, 4>}, {pipeline_mode = #tpu.pipeline_mode<synchronous>, transform_indices = @transform_5, window_bounds = array<i64: 4, 1>}, {transform_indices = @transform_6, window_bounds = array<i64: 1, 4, 256>}]} {
    %c0 = arith.constant 0 : index
    %c0_0 = arith.constant 0 : index
    %c0_1 = arith.constant 0 : index
    %0 = vector.load %arg1[%c0, %c0_0, %c0_1] : memref<1x4x256xf32, #tpu.memory_space<vmem>>, vector<1x4x256xf32>
    %1 = vector.shape_cast %0 : vector<1x4x256xf32> to vector<4x256xf32>
    %c17_i32 = arith.constant 17 : i32
    %2 = tpu.dynamic_rotate %1 by %c17_i32 dim 1 : vector<4x256xf32>, i32 -> vector<4x256xf32>
    %c0_2 = arith.constant 0 : index
    %c0_3 = arith.constant 0 : index
    %c0_4 = arith.constant 0 : index
    %3 = vector.load %arg2[%c0_2, %c0_3, %c0_4] : memref<9x1x256xf32, #tpu.memory_space<vmem>>, vector<1x1x256xf32>
    %4 = vector.shape_cast %3 : vector<1x1x256xf32> to vector<1x256xf32>
    %5 = vector.broadcast %4 : vector<1x256xf32> to vector<4x256xf32>
    %6 = arith.mulf %2, %5 : vector<4x256xf32>
    %c0_5 = arith.constant 0 : index
    %c0_6 = arith.constant 0 : index
    %c0_7 = arith.constant 0 : index
    %7 = vector.load %arg3[%c0_5, %c0_6, %c0_7] : memref<9x4x4xf32, #tpu.memory_space<vmem>>, vector<1x4x4xf32>
    %8 = vector.shape_cast %7 : vector<1x4x4xf32> to vector<4x4xf32>
    %cst = arith.constant dense<0.000000e+00> : vector<4x256xf32>
    %9 = tpu.matmul %8, %6, %cst {dimension_numbers = #tpu.dot_dimension_numbers<[1], [0], [0], [1], [0, 0, 1, 1], [], []>} : vector<4x4xf32>, vector<4x256xf32>, vector<4x256xf32> -> vector<4x256xf32>
    %c16_i32 = arith.constant 16 : i32
    %10 = tpu.dynamic_rotate %1 by %c16_i32 dim 1 : vector<4x256xf32>, i32 -> vector<4x256xf32>
    %c1 = arith.constant 1 : index
    %c0_8 = arith.constant 0 : index
    %c0_9 = arith.constant 0 : index
    %11 = vector.load %arg2[%c1, %c0_8, %c0_9] : memref<9x1x256xf32, #tpu.memory_space<vmem>>, vector<1x1x256xf32>
    %12 = vector.shape_cast %11 : vector<1x1x256xf32> to vector<1x256xf32>
    %13 = vector.broadcast %12 : vector<1x256xf32> to vector<4x256xf32>
    %14 = arith.mulf %10, %13 : vector<4x256xf32>
    %c1_10 = arith.constant 1 : index
    %c0_11 = arith.constant 0 : index
    %c0_12 = arith.constant 0 : index
    %15 = vector.load %arg3[%c1_10, %c0_11, %c0_12] : memref<9x4x4xf32, #tpu.memory_space<vmem>>, vector<1x4x4xf32>
    %16 = vector.shape_cast %15 : vector<1x4x4xf32> to vector<4x4xf32>
    %cst_13 = arith.constant dense<0.000000e+00> : vector<4x256xf32>
    %17 = tpu.matmul %16, %14, %cst_13 {dimension_numbers = #tpu.dot_dimension_numbers<[1], [0], [0], [1], [0, 0, 1, 1], [], []>} : vector<4x4xf32>, vector<4x256xf32>, vector<4x256xf32> -> vector<4x256xf32>
    %18 = arith.addf %9, %17 : vector<4x256xf32>
    %c15_i32 = arith.constant 15 : i32
    %19 = tpu.dynamic_rotate %1 by %c15_i32 dim 1 : vector<4x256xf32>, i32 -> vector<4x256xf32>
    %c2 = arith.constant 2 : index
    %c0_14 = arith.constant 0 : index
    %c0_15 = arith.constant 0 : index
    %20 = vector.load %arg2[%c2, %c0_14, %c0_15] : memref<9x1x256xf32, #tpu.memory_space<vmem>>, vector<1x1x256xf32>
    %21 = vector.shape_cast %20 : vector<1x1x256xf32> to vector<1x256xf32>
    %22 = vector.broadcast %21 : vector<1x256xf32> to vector<4x256xf32>
    %23 = arith.mulf %19, %22 : vector<4x256xf32>
    %c2_16 = arith.constant 2 : index
    %c0_17 = arith.constant 0 : index
    %c0_18 = arith.constant 0 : index
    %24 = vector.load %arg3[%c2_16, %c0_17, %c0_18] : memref<9x4x4xf32, #tpu.memory_space<vmem>>, vector<1x4x4xf32>
    %25 = vector.shape_cast %24 : vector<1x4x4xf32> to vector<4x4xf32>
    %cst_19 = arith.constant dense<0.000000e+00> : vector<4x256xf32>
    %26 = tpu.matmul %25, %23, %cst_19 {dimension_numbers = #tpu.dot_dimension_numbers<[1], [0], [0], [1], [0, 0, 1, 1], [], []>} : vector<4x4xf32>, vector<4x256xf32>, vector<4x256xf32> -> vector<4x256xf32>
    %27 = arith.addf %18, %26 : vector<4x256xf32>
    %c1_i32 = arith.constant 1 : i32
    %28 = tpu.dynamic_rotate %1 by %c1_i32 dim 1 : vector<4x256xf32>, i32 -> vector<4x256xf32>
    %c3 = arith.constant 3 : index
    %c0_20 = arith.constant 0 : index
    %c0_21 = arith.constant 0 : index
    %29 = vector.load %arg2[%c3, %c0_20, %c0_21] : memref<9x1x256xf32, #tpu.memory_space<vmem>>, vector<1x1x256xf32>
    %30 = vector.shape_cast %29 : vector<1x1x256xf32> to vector<1x256xf32>
    %31 = vector.broadcast %30 : vector<1x256xf32> to vector<4x256xf32>
    %32 = arith.mulf %28, %31 : vector<4x256xf32>
    %c3_22 = arith.constant 3 : index
    %c0_23 = arith.constant 0 : index
    %c0_24 = arith.constant 0 : index
    %33 = vector.load %arg3[%c3_22, %c0_23, %c0_24] : memref<9x4x4xf32, #tpu.memory_space<vmem>>, vector<1x4x4xf32>
    %34 = vector.shape_cast %33 : vector<1x4x4xf32> to vector<4x4xf32>
    %cst_25 = arith.constant dense<0.000000e+00> : vector<4x256xf32>
    %35 = tpu.matmul %34, %32, %cst_25 {dimension_numbers = #tpu.dot_dimension_numbers<[1], [0], [0], [1], [0, 0, 1, 1], [], []>} : vector<4x4xf32>, vector<4x256xf32>, vector<4x256xf32> -> vector<4x256xf32>
    %36 = arith.addf %27, %35 : vector<4x256xf32>
    %c4 = arith.constant 4 : index
    %c0_26 = arith.constant 0 : index
    %c0_27 = arith.constant 0 : index
    %37 = vector.load %arg3[%c4, %c0_26, %c0_27] : memref<9x4x4xf32, #tpu.memory_space<vmem>>, vector<1x4x4xf32>
    %38 = vector.shape_cast %37 : vector<1x4x4xf32> to vector<4x4xf32>
    %cst_28 = arith.constant dense<0.000000e+00> : vector<4x256xf32>
    %39 = tpu.matmul %38, %1, %cst_28 {dimension_numbers = #tpu.dot_dimension_numbers<[1], [0], [0], [1], [0, 0, 1, 1], [], []>} : vector<4x4xf32>, vector<4x256xf32>, vector<4x256xf32> -> vector<4x256xf32>
    %40 = arith.addf %36, %39 : vector<4x256xf32>
    %c255_i32 = arith.constant 255 : i32
    %41 = tpu.dynamic_rotate %1 by %c255_i32 dim 1 : vector<4x256xf32>, i32 -> vector<4x256xf32>
    %c5 = arith.constant 5 : index
    %c0_29 = arith.constant 0 : index
    %c0_30 = arith.constant 0 : index
    %42 = vector.load %arg2[%c5, %c0_29, %c0_30] : memref<9x1x256xf32, #tpu.memory_space<vmem>>, vector<1x1x256xf32>
    %43 = vector.shape_cast %42 : vector<1x1x256xf32> to vector<1x256xf32>
    %44 = vector.broadcast %43 : vector<1x256xf32> to vector<4x256xf32>
    %45 = arith.mulf %41, %44 : vector<4x256xf32>
    %c5_31 = arith.constant 5 : index
    %c0_32 = arith.constant 0 : index
    %c0_33 = arith.constant 0 : index
    %46 = vector.load %arg3[%c5_31, %c0_32, %c0_33] : memref<9x4x4xf32, #tpu.memory_space<vmem>>, vector<1x4x4xf32>
    %47 = vector.shape_cast %46 : vector<1x4x4xf32> to vector<4x4xf32>
    %cst_34 = arith.constant dense<0.000000e+00> : vector<4x256xf32>
    %48 = tpu.matmul %47, %45, %cst_34 {dimension_numbers = #tpu.dot_dimension_numbers<[1], [0], [0], [1], [0, 0, 1, 1], [], []>} : vector<4x4xf32>, vector<4x256xf32>, vector<4x256xf32> -> vector<4x256xf32>
    %49 = arith.addf %40, %48 : vector<4x256xf32>
    %c241_i32 = arith.constant 241 : i32
    %50 = tpu.dynamic_rotate %1 by %c241_i32 dim 1 : vector<4x256xf32>, i32 -> vector<4x256xf32>
    %c6 = arith.constant 6 : index
    %c0_35 = arith.constant 0 : index
    %c0_36 = arith.constant 0 : index
    %51 = vector.load %arg2[%c6, %c0_35, %c0_36] : memref<9x1x256xf32, #tpu.memory_space<vmem>>, vector<1x1x256xf32>
    %52 = vector.shape_cast %51 : vector<1x1x256xf32> to vector<1x256xf32>
    %53 = vector.broadcast %52 : vector<1x256xf32> to vector<4x256xf32>
    %54 = arith.mulf %50, %53 : vector<4x256xf32>
    %c6_37 = arith.constant 6 : index
    %c0_38 = arith.constant 0 : index
    %c0_39 = arith.constant 0 : index
    %55 = vector.load %arg3[%c6_37, %c0_38, %c0_39] : memref<9x4x4xf32, #tpu.memory_space<vmem>>, vector<1x4x4xf32>
    %56 = vector.shape_cast %55 : vector<1x4x4xf32> to vector<4x4xf32>
    %cst_40 = arith.constant dense<0.000000e+00> : vector<4x256xf32>
    %57 = tpu.matmul %56, %54, %cst_40 {dimension_numbers = #tpu.dot_dimension_numbers<[1], [0], [0], [1], [0, 0, 1, 1], [], []>} : vector<4x4xf32>, vector<4x256xf32>, vector<4x256xf32> -> vector<4x256xf32>
    %58 = arith.addf %49, %57 : vector<4x256xf32>
    %c240_i32 = arith.constant 240 : i32
    %59 = tpu.dynamic_rotate %1 by %c240_i32 dim 1 : vector<4x256xf32>, i32 -> vector<4x256xf32>
    %c7 = arith.constant 7 : index
    %c0_41 = arith.constant 0 : index
    %c0_42 = arith.constant 0 : index
    %60 = vector.load %arg2[%c7, %c0_41, %c0_42] : memref<9x1x256xf32, #tpu.memory_space<vmem>>, vector<1x1x256xf32>
    %61 = vector.shape_cast %60 : vector<1x1x256xf32> to vector<1x256xf32>
    %62 = vector.broadcast %61 : vector<1x256xf32> to vector<4x256xf32>
    %63 = arith.mulf %59, %62 : vector<4x256xf32>
    %c7_43 = arith.constant 7 : index
    %c0_44 = arith.constant 0 : index
    %c0_45 = arith.constant 0 : index
    %64 = vector.load %arg3[%c7_43, %c0_44, %c0_45] : memref<9x4x4xf32, #tpu.memory_space<vmem>>, vector<1x4x4xf32>
    %65 = vector.shape_cast %64 : vector<1x4x4xf32> to vector<4x4xf32>
    %cst_46 = arith.constant dense<0.000000e+00> : vector<4x256xf32>
    %66 = tpu.matmul %65, %63, %cst_46 {dimension_numbers = #tpu.dot_dimension_numbers<[1], [0], [0], [1], [0, 0, 1, 1], [], []>} : vector<4x4xf32>, vector<4x256xf32>, vector<4x256xf32> -> vector<4x256xf32>
    %67 = arith.addf %58, %66 : vector<4x256xf32>
    %c239_i32 = arith.constant 239 : i32
    %68 = tpu.dynamic_rotate %1 by %c239_i32 dim 1 : vector<4x256xf32>, i32 -> vector<4x256xf32>
    %c8 = arith.constant 8 : index
    %c0_47 = arith.constant 0 : index
    %c0_48 = arith.constant 0 : index
    %69 = vector.load %arg2[%c8, %c0_47, %c0_48] : memref<9x1x256xf32, #tpu.memory_space<vmem>>, vector<1x1x256xf32>
    %70 = vector.shape_cast %69 : vector<1x1x256xf32> to vector<1x256xf32>
    %71 = vector.broadcast %70 : vector<1x256xf32> to vector<4x256xf32>
    %72 = arith.mulf %68, %71 : vector<4x256xf32>
    %c8_49 = arith.constant 8 : index
    %c0_50 = arith.constant 0 : index
    %c0_51 = arith.constant 0 : index
    %73 = vector.load %arg3[%c8_49, %c0_50, %c0_51] : memref<9x4x4xf32, #tpu.memory_space<vmem>>, vector<1x4x4xf32>
    %74 = vector.shape_cast %73 : vector<1x4x4xf32> to vector<4x4xf32>
    %cst_52 = arith.constant dense<0.000000e+00> : vector<4x256xf32>
    %75 = tpu.matmul %74, %72, %cst_52 {dimension_numbers = #tpu.dot_dimension_numbers<[1], [0], [0], [1], [0, 0, 1, 1], [], []>} : vector<4x4xf32>, vector<4x256xf32>, vector<4x256xf32> -> vector<4x256xf32>
    %76 = arith.addf %67, %75 : vector<4x256xf32>
    %c0_53 = arith.constant 0 : index
    %c0_54 = arith.constant 0 : index
    %77 = vector.load %arg4[%c0_53, %c0_54] : memref<4x1xf32, #tpu.memory_space<vmem>>, vector<4x1xf32>
    %78 = vector.broadcast %77 : vector<4x1xf32> to vector<4x256xf32>
    %79 = arith.addf %76, %78 : vector<4x256xf32>
    %cst_55 = arith.constant 0.000000e+00 : f32
    %80 = vector.broadcast %cst_55 : f32 to vector<4x256xf32>
    %81 = arith.maximumf %79, %80 : vector<4x256xf32>
    %c17_i32_56 = arith.constant 17 : i32
    %82 = tpu.dynamic_rotate %81 by %c17_i32_56 dim 1 : vector<4x256xf32>, i32 -> vector<4x256xf32>
    %c0_57 = arith.constant 0 : index
    %c0_58 = arith.constant 0 : index
    %c0_59 = arith.constant 0 : index
    %83 = vector.load %arg2[%c0_57, %c0_58, %c0_59] : memref<9x1x256xf32, #tpu.memory_space<vmem>>, vector<1x1x256xf32>
    %84 = vector.shape_cast %83 : vector<1x1x256xf32> to vector<1x256xf32>
    %85 = vector.broadcast %84 : vector<1x256xf32> to vector<4x256xf32>
    %86 = arith.mulf %82, %85 : vector<4x256xf32>
    %c0_60 = arith.constant 0 : index
    %c0_61 = arith.constant 0 : index
    %c0_62 = arith.constant 0 : index
    %87 = vector.load %arg5[%c0_60, %c0_61, %c0_62] : memref<9x4x4xf32, #tpu.memory_space<vmem>>, vector<1x4x4xf32>
    %88 = vector.shape_cast %87 : vector<1x4x4xf32> to vector<4x4xf32>
    %cst_63 = arith.constant dense<0.000000e+00> : vector<4x256xf32>
    %89 = tpu.matmul %88, %86, %cst_63 {dimension_numbers = #tpu.dot_dimension_numbers<[1], [0], [0], [1], [0, 0, 1, 1], [], []>} : vector<4x4xf32>, vector<4x256xf32>, vector<4x256xf32> -> vector<4x256xf32>
    %c16_i32_64 = arith.constant 16 : i32
    %90 = tpu.dynamic_rotate %81 by %c16_i32_64 dim 1 : vector<4x256xf32>, i32 -> vector<4x256xf32>
    %c1_65 = arith.constant 1 : index
    %c0_66 = arith.constant 0 : index
    %c0_67 = arith.constant 0 : index
    %91 = vector.load %arg2[%c1_65, %c0_66, %c0_67] : memref<9x1x256xf32, #tpu.memory_space<vmem>>, vector<1x1x256xf32>
    %92 = vector.shape_cast %91 : vector<1x1x256xf32> to vector<1x256xf32>
    %93 = vector.broadcast %92 : vector<1x256xf32> to vector<4x256xf32>
    %94 = arith.mulf %90, %93 : vector<4x256xf32>
    %c1_68 = arith.constant 1 : index
    %c0_69 = arith.constant 0 : index
    %c0_70 = arith.constant 0 : index
    %95 = vector.load %arg5[%c1_68, %c0_69, %c0_70] : memref<9x4x4xf32, #tpu.memory_space<vmem>>, vector<1x4x4xf32>
    %96 = vector.shape_cast %95 : vector<1x4x4xf32> to vector<4x4xf32>
    %cst_71 = arith.constant dense<0.000000e+00> : vector<4x256xf32>
    %97 = tpu.matmul %96, %94, %cst_71 {dimension_numbers = #tpu.dot_dimension_numbers<[1], [0], [0], [1], [0, 0, 1, 1], [], []>} : vector<4x4xf32>, vector<4x256xf32>, vector<4x256xf32> -> vector<4x256xf32>
    %98 = arith.addf %89, %97 : vector<4x256xf32>
    %c15_i32_72 = arith.constant 15 : i32
    %99 = tpu.dynamic_rotate %81 by %c15_i32_72 dim 1 : vector<4x256xf32>, i32 -> vector<4x256xf32>
    %c2_73 = arith.constant 2 : index
    %c0_74 = arith.constant 0 : index
    %c0_75 = arith.constant 0 : index
    %100 = vector.load %arg2[%c2_73, %c0_74, %c0_75] : memref<9x1x256xf32, #tpu.memory_space<vmem>>, vector<1x1x256xf32>
    %101 = vector.shape_cast %100 : vector<1x1x256xf32> to vector<1x256xf32>
    %102 = vector.broadcast %101 : vector<1x256xf32> to vector<4x256xf32>
    %103 = arith.mulf %99, %102 : vector<4x256xf32>
    %c2_76 = arith.constant 2 : index
    %c0_77 = arith.constant 0 : index
    %c0_78 = arith.constant 0 : index
    %104 = vector.load %arg5[%c2_76, %c0_77, %c0_78] : memref<9x4x4xf32, #tpu.memory_space<vmem>>, vector<1x4x4xf32>
    %105 = vector.shape_cast %104 : vector<1x4x4xf32> to vector<4x4xf32>
    %cst_79 = arith.constant dense<0.000000e+00> : vector<4x256xf32>
    %106 = tpu.matmul %105, %103, %cst_79 {dimension_numbers = #tpu.dot_dimension_numbers<[1], [0], [0], [1], [0, 0, 1, 1], [], []>} : vector<4x4xf32>, vector<4x256xf32>, vector<4x256xf32> -> vector<4x256xf32>
    %107 = arith.addf %98, %106 : vector<4x256xf32>
    %c1_i32_80 = arith.constant 1 : i32
    %108 = tpu.dynamic_rotate %81 by %c1_i32_80 dim 1 : vector<4x256xf32>, i32 -> vector<4x256xf32>
    %c3_81 = arith.constant 3 : index
    %c0_82 = arith.constant 0 : index
    %c0_83 = arith.constant 0 : index
    %109 = vector.load %arg2[%c3_81, %c0_82, %c0_83] : memref<9x1x256xf32, #tpu.memory_space<vmem>>, vector<1x1x256xf32>
    %110 = vector.shape_cast %109 : vector<1x1x256xf32> to vector<1x256xf32>
    %111 = vector.broadcast %110 : vector<1x256xf32> to vector<4x256xf32>
    %112 = arith.mulf %108, %111 : vector<4x256xf32>
    %c3_84 = arith.constant 3 : index
    %c0_85 = arith.constant 0 : index
    %c0_86 = arith.constant 0 : index
    %113 = vector.load %arg5[%c3_84, %c0_85, %c0_86] : memref<9x4x4xf32, #tpu.memory_space<vmem>>, vector<1x4x4xf32>
    %114 = vector.shape_cast %113 : vector<1x4x4xf32> to vector<4x4xf32>
    %cst_87 = arith.constant dense<0.000000e+00> : vector<4x256xf32>
    %115 = tpu.matmul %114, %112, %cst_87 {dimension_numbers = #tpu.dot_dimension_numbers<[1], [0], [0], [1], [0, 0, 1, 1], [], []>} : vector<4x4xf32>, vector<4x256xf32>, vector<4x256xf32> -> vector<4x256xf32>
    %116 = arith.addf %107, %115 : vector<4x256xf32>
    %c4_88 = arith.constant 4 : index
    %c0_89 = arith.constant 0 : index
    %c0_90 = arith.constant 0 : index
    %117 = vector.load %arg5[%c4_88, %c0_89, %c0_90] : memref<9x4x4xf32, #tpu.memory_space<vmem>>, vector<1x4x4xf32>
    %118 = vector.shape_cast %117 : vector<1x4x4xf32> to vector<4x4xf32>
    %cst_91 = arith.constant dense<0.000000e+00> : vector<4x256xf32>
    %119 = tpu.matmul %118, %81, %cst_91 {dimension_numbers = #tpu.dot_dimension_numbers<[1], [0], [0], [1], [0, 0, 1, 1], [], []>} : vector<4x4xf32>, vector<4x256xf32>, vector<4x256xf32> -> vector<4x256xf32>
    %120 = arith.addf %116, %119 : vector<4x256xf32>
    %c255_i32_92 = arith.constant 255 : i32
    %121 = tpu.dynamic_rotate %81 by %c255_i32_92 dim 1 : vector<4x256xf32>, i32 -> vector<4x256xf32>
    %c5_93 = arith.constant 5 : index
    %c0_94 = arith.constant 0 : index
    %c0_95 = arith.constant 0 : index
    %122 = vector.load %arg2[%c5_93, %c0_94, %c0_95] : memref<9x1x256xf32, #tpu.memory_space<vmem>>, vector<1x1x256xf32>
    %123 = vector.shape_cast %122 : vector<1x1x256xf32> to vector<1x256xf32>
    %124 = vector.broadcast %123 : vector<1x256xf32> to vector<4x256xf32>
    %125 = arith.mulf %121, %124 : vector<4x256xf32>
    %c5_96 = arith.constant 5 : index
    %c0_97 = arith.constant 0 : index
    %c0_98 = arith.constant 0 : index
    %126 = vector.load %arg5[%c5_96, %c0_97, %c0_98] : memref<9x4x4xf32, #tpu.memory_space<vmem>>, vector<1x4x4xf32>
    %127 = vector.shape_cast %126 : vector<1x4x4xf32> to vector<4x4xf32>
    %cst_99 = arith.constant dense<0.000000e+00> : vector<4x256xf32>
    %128 = tpu.matmul %127, %125, %cst_99 {dimension_numbers = #tpu.dot_dimension_numbers<[1], [0], [0], [1], [0, 0, 1, 1], [], []>} : vector<4x4xf32>, vector<4x256xf32>, vector<4x256xf32> -> vector<4x256xf32>
    %129 = arith.addf %120, %128 : vector<4x256xf32>
    %c241_i32_100 = arith.constant 241 : i32
    %130 = tpu.dynamic_rotate %81 by %c241_i32_100 dim 1 : vector<4x256xf32>, i32 -> vector<4x256xf32>
    %c6_101 = arith.constant 6 : index
    %c0_102 = arith.constant 0 : index
    %c0_103 = arith.constant 0 : index
    %131 = vector.load %arg2[%c6_101, %c0_102, %c0_103] : memref<9x1x256xf32, #tpu.memory_space<vmem>>, vector<1x1x256xf32>
    %132 = vector.shape_cast %131 : vector<1x1x256xf32> to vector<1x256xf32>
    %133 = vector.broadcast %132 : vector<1x256xf32> to vector<4x256xf32>
    %134 = arith.mulf %130, %133 : vector<4x256xf32>
    %c6_104 = arith.constant 6 : index
    %c0_105 = arith.constant 0 : index
    %c0_106 = arith.constant 0 : index
    %135 = vector.load %arg5[%c6_104, %c0_105, %c0_106] : memref<9x4x4xf32, #tpu.memory_space<vmem>>, vector<1x4x4xf32>
    %136 = vector.shape_cast %135 : vector<1x4x4xf32> to vector<4x4xf32>
    %cst_107 = arith.constant dense<0.000000e+00> : vector<4x256xf32>
    %137 = tpu.matmul %136, %134, %cst_107 {dimension_numbers = #tpu.dot_dimension_numbers<[1], [0], [0], [1], [0, 0, 1, 1], [], []>} : vector<4x4xf32>, vector<4x256xf32>, vector<4x256xf32> -> vector<4x256xf32>
    %138 = arith.addf %129, %137 : vector<4x256xf32>
    %c240_i32_108 = arith.constant 240 : i32
    %139 = tpu.dynamic_rotate %81 by %c240_i32_108 dim 1 : vector<4x256xf32>, i32 -> vector<4x256xf32>
    %c7_109 = arith.constant 7 : index
    %c0_110 = arith.constant 0 : index
    %c0_111 = arith.constant 0 : index
    %140 = vector.load %arg2[%c7_109, %c0_110, %c0_111] : memref<9x1x256xf32, #tpu.memory_space<vmem>>, vector<1x1x256xf32>
    %141 = vector.shape_cast %140 : vector<1x1x256xf32> to vector<1x256xf32>
    %142 = vector.broadcast %141 : vector<1x256xf32> to vector<4x256xf32>
    %143 = arith.mulf %139, %142 : vector<4x256xf32>
    %c7_112 = arith.constant 7 : index
    %c0_113 = arith.constant 0 : index
    %c0_114 = arith.constant 0 : index
    %144 = vector.load %arg5[%c7_112, %c0_113, %c0_114] : memref<9x4x4xf32, #tpu.memory_space<vmem>>, vector<1x4x4xf32>
    %145 = vector.shape_cast %144 : vector<1x4x4xf32> to vector<4x4xf32>
    %cst_115 = arith.constant dense<0.000000e+00> : vector<4x256xf32>
    %146 = tpu.matmul %145, %143, %cst_115 {dimension_numbers = #tpu.dot_dimension_numbers<[1], [0], [0], [1], [0, 0, 1, 1], [], []>} : vector<4x4xf32>, vector<4x256xf32>, vector<4x256xf32> -> vector<4x256xf32>
    %147 = arith.addf %138, %146 : vector<4x256xf32>
    %c239_i32_116 = arith.constant 239 : i32
    %148 = tpu.dynamic_rotate %81 by %c239_i32_116 dim 1 : vector<4x256xf32>, i32 -> vector<4x256xf32>
    %c8_117 = arith.constant 8 : index
    %c0_118 = arith.constant 0 : index
    %c0_119 = arith.constant 0 : index
    %149 = vector.load %arg2[%c8_117, %c0_118, %c0_119] : memref<9x1x256xf32, #tpu.memory_space<vmem>>, vector<1x1x256xf32>
    %150 = vector.shape_cast %149 : vector<1x1x256xf32> to vector<1x256xf32>
    %151 = vector.broadcast %150 : vector<1x256xf32> to vector<4x256xf32>
    %152 = arith.mulf %148, %151 : vector<4x256xf32>
    %c8_120 = arith.constant 8 : index
    %c0_121 = arith.constant 0 : index
    %c0_122 = arith.constant 0 : index
    %153 = vector.load %arg5[%c8_120, %c0_121, %c0_122] : memref<9x4x4xf32, #tpu.memory_space<vmem>>, vector<1x4x4xf32>
    %154 = vector.shape_cast %153 : vector<1x4x4xf32> to vector<4x4xf32>
    %cst_123 = arith.constant dense<0.000000e+00> : vector<4x256xf32>
    %155 = tpu.matmul %154, %152, %cst_123 {dimension_numbers = #tpu.dot_dimension_numbers<[1], [0], [0], [1], [0, 0, 1, 1], [], []>} : vector<4x4xf32>, vector<4x256xf32>, vector<4x256xf32> -> vector<4x256xf32>
    %156 = arith.addf %147, %155 : vector<4x256xf32>
    %c0_124 = arith.constant 0 : index
    %c0_125 = arith.constant 0 : index
    %157 = vector.load %arg6[%c0_124, %c0_125] : memref<4x1xf32, #tpu.memory_space<vmem>>, vector<4x1xf32>
    %158 = vector.broadcast %157 : vector<4x1xf32> to vector<4x256xf32>
    %159 = arith.addf %156, %158 : vector<4x256xf32>
    %160 = arith.addf %159, %1 : vector<4x256xf32>
    %cst_126 = arith.constant 0.000000e+00 : f32
    %161 = vector.broadcast %cst_126 : f32 to vector<4x256xf32>
    %162 = arith.maximumf %160, %161 : vector<4x256xf32>
    %c0_127 = arith.constant 0 : index
    %c0_128 = arith.constant 0 : index
    %c0_129 = arith.constant 0 : index
    %163 = vector.load %arg7[%c0_127, %c0_128, %c0_129] : memref<1x4x256xf32, #tpu.memory_space<vmem>>, vector<1x4x256xf32>
    %164 = vector.shape_cast %163 : vector<1x4x256xf32> to vector<4x256xf32>
    %165 = vector.shape_cast %162 : vector<4x256xf32> to vector<1x4x256xf32>
    tpu.vector_store %arg7[%c0_127, %c0_128, %c0_129], %165 {strides = array<i32>} : memref<1x4x256xf32, #tpu.memory_space<vmem>>, vector<1x4x256xf32>,
    return
  }
  func.func @transform_0(%arg0: i32) -> (i32, i32, i32) {
    %c0_i32 = arith.constant 0 : i32
    %c0_i32_0 = arith.constant 0 : i32
    %c0_i32_1 = arith.constant 0 : i32
    return %arg0, %c0_i32, %c0_i32_0 : i32, i32, i32
  }
  func.func @transform_1(%arg0: i32) -> (i32, i32, i32) {
    %c0_i32 = arith.constant 0 : i32
    %c0_i32_0 = arith.constant 0 : i32
    %c0_i32_1 = arith.constant 0 : i32
    %c0_i32_2 = arith.constant 0 : i32
    return %c0_i32, %c0_i32_0, %c0_i32_1 : i32, i32, i32
  }
  func.func @transform_2(%arg0: i32) -> (i32, i32, i32) {
    %c0_i32 = arith.constant 0 : i32
    %c0_i32_0 = arith.constant 0 : i32
    %c0_i32_1 = arith.constant 0 : i32
    %c0_i32_2 = arith.constant 0 : i32
    return %c0_i32, %c0_i32_0, %c0_i32_1 : i32, i32, i32
  }
  func.func @transform_3(%arg0: i32) -> (i32, i32) {
    %c0_i32 = arith.constant 0 : i32
    %c0_i32_0 = arith.constant 0 : i32
    %c0_i32_1 = arith.constant 0 : i32
    return %c0_i32, %c0_i32_0 : i32, i32
  }
  func.func @transform_4(%arg0: i32) -> (i32, i32, i32) {
    %c0_i32 = arith.constant 0 : i32
    %c0_i32_0 = arith.constant 0 : i32
    %c0_i32_1 = arith.constant 0 : i32
    %c0_i32_2 = arith.constant 0 : i32
    return %c0_i32, %c0_i32_0, %c0_i32_1 : i32, i32, i32
  }
  func.func @transform_5(%arg0: i32) -> (i32, i32) {
    %c0_i32 = arith.constant 0 : i32
    %c0_i32_0 = arith.constant 0 : i32
    %c0_i32_1 = arith.constant 0 : i32
    return %c0_i32, %c0_i32_0 : i32, i32
  }
  func.func @transform_6(%arg0: i32) -> (i32, i32, i32) {
    %c0_i32 = arith.constant 0 : i32
    %c0_i32_0 = arith.constant 0 : i32
    %c0_i32_1 = arith.constant 0 : i32
    return %arg0, %c0_i32, %c0_i32_0 : i32, i32, i32
  }
}

</mosaic_0001>

<bundles_post_ra>
// kernel: basic_block.1
= control target key start
LH: loop header
LB: loop body
LE: loop exit
PB: predicated region body
PF: predicated region fallthrough
CT: control target
= control target key end

     0   :  { %s2276_s21 = smov 0   ;;  %s2683_s0 = inlined_call_operand.vmem [shape: f32[2,4,256], index: 0, kind: input, shape index: {}]   ;;  %s2684_s1 = inlined_call_operand.vmem [shape: f32[9,1,256], index: 1, kind: input, shape index: {}]   ;;  %s2685_s2 = inlined_call_operand.vmem [shape: f32[9,4,4], index: 2, kind: input, shape index: {}]   ;;  %s2686_s3 = inlined_call_operand.vmem [shape: f32[4,1], index: 3, kind: input, shape index: {}]   ;;  %s2687_s4 = inlined_call_operand.vmem [shape: f32[9,4,4], index: 4, kind: input, shape index: {}]   ;;  %s2688_s5 = inlined_call_operand.vmem [shape: f32[4,1], index: 5, kind: input, shape index: {}]   ;;  %s2689_s6 = inlined_call_operand.vmem [shape: f32[2,4,256], index: 6, kind: output, shape index: {}]  }
   0x1 LB: > { %s2081_s22 = sadd.s32 4294967295, %s2229_s21   ;;  %p2085_p0 = scmp.ge.s32.totalorder %s2229_s21, 1  ;;  %s2229_s21 = sphi %s2276_s21, %s16_s21  }
   0x2   : > { %p212_p1 = scmp.lt.s32.totalorder %s2229_s21, 3 }
   0x4   : > { %p213_p2 = pnand %p2085_p0, %p212_p1 }
   0x5   : > { %p242_p3 = scmp.lt.s32.totalorder (!%p213_p2), %s2081_s22, 1  ;;  %v2231_v0 = vmov (!%p213_p2), 0.0   ;;  %s2232_s27 = smov (!%p213_p2), 17   ;;  %v1184_v3 = vld [vmem:[%s2686_s3] sm:$0xf] (!%p213_p2)  ;;  %v2240_v4 = vmov (!%p213_p2), 0   ;;  %v260_v5 = vlaneseq (!%p213_p2) }
   0x6   : > { %216 = sbr.rel (%p213_p2) target bundleno = 831 (0x33f), region = 44  ;;  %379 = vmatprep.mubr.f32.mxu0 (!%p213_p2), %v2231_v0  ;;  %1286 = vmatprep.mubr.f32.mxu1 (!%p213_p2), %v2231_v0  ;;  %s2233_s28 = smov (!%p213_p2), 16   ;;  %v265_v10 = vld [vmem:[%s2684_s1] sm:$0x3] (!%p213_p2)  ;;  %v2090_v11 = vld [vmem:[%s2684_s1 + $0x2] sm:$0x3] (!%p213_p2) }
   0x7   : > { %s2234_s29 = smov (!%p213_p2), 15   ;;  %s2235_s30 = smov (!%p213_p2), 1   ;;  %2221 = vset.pattern.permute.xlu0 (!%p213_p2), %v2240_v4  ;;  %v268_v6 = vshrl.u32 (!%p213_p2), %v260_v5, 7  ;;  %v2335_v7 = vand.u32 (!%p213_p2), 127, %v260_v5  ;;  %v2098_v18 = vld [vmem:[%s2684_s1 + $0x4] sm:$0x3] (!%p213_p2) }
   0x8   : > { %s2236_s7 = smov (!%p213_p2), 127   ;;  %s2237_s8 = smov (!%p213_p2), 113   ;;  %vm308_vm2 = vcmask (!%p213_p2), 1043456   ;;  %v2091_v30 = vld [vmem:[%s2685_s2 + $0x4] sm:$0xf] (!%p213_p2)  ;;  %vm304_vm4 = vcmask (!%p213_p2), 31744  }
   0x9   : > { %s2238_s9 = smov (!%p213_p2), 112   ;;  %s2239_s10 = smov (!%p213_p2), 111   ;;  %v2337_v8 = vsub.s32 (!%p213_p2), 0, %v268_v6  ;;  %v2339_v9 = vsub.s32 (!%p213_p2), 1, %v268_v6  ;;  %vm262_vm0 = vcmp.lt.s32.totalorder (!%p213_p2), %v2335_v7, 17  ;;  %vm284_vm1 = vcmp.lt.s32.totalorder (!%p213_p2), %v2335_v7, 16 }
   0xa   : > { %vm470_vm3 = vcmp.lt.s32.totalorder (!%p213_p2), %v2335_v7, 15  ;;  %v2103_v34 = vld [vmem:[%s2684_s1 + $0x6] sm:$0x3] (!%p213_p2)  ;;  %vm576_vm5 = vcmp.lt.s32.totalorder (!%p213_p2), %v2335_v7, 1  ;;  %v279_v43 = vld [vmem:[%s2685_s2] sm:$0xf] (!%p213_p2) }
   0xb   : > { %v2349_v14 = vrot.slane (!%p213_p2), %v265_v10, %v2339_v9  ;;  %v2353_v15 = vrot.slane (!%p213_p2), %v2090_v11, %v2337_v8  ;;  %v2356_v16 = vrot.slane (!%p213_p2), %v2090_v11, %v2339_v9  ;;  %v2359_v17 = vrot.slane (!%p213_p2), %v265_v10, %v2337_v8  ;;  %v2099_v48 = vld [vmem:[%s2685_s2 + $0x8] sm:$0xf] (!%p213_p2)  ;;  %v2104_v54 = vld [vmem:[%s2685_s2 + $0xc] sm:$0xf] (!%p213_p2) }
   0xc   : > { %v2377_v28 = vrot.slane (!%p213_p2), %v2098_v18, %v2339_v9  ;;  %v2396_v36 = vrot.slane (!%p213_p2), %v2098_v18, %v2337_v8  ;;  %v2403_v39 = vrot.slane (!%p213_p2), %v2103_v34, %v2339_v9  ;;  %v2415_v45 = vrot.slane (!%p213_p2), %v2103_v34, %v2337_v8  ;;  %v2112_v49 = vld [vmem:[%s2684_s1 + $0xa] sm:$0x3] (!%p213_p2)  ;;  %v2117_v56 = vld [vmem:[%s2684_s1 + $0xc] sm:$0x3] (!%p213_p2)  ;;  %v2122_v5 = vld [vmem:[%s2684_s1 + $0xe] sm:$0x3] (!%p213_p2) }
   0xd   : > { %s2691_s22 = smov (!%p242_p3, %s2081_s22), 1  ;;  %vm764_vm6 = vcmp.lt.s32.totalorder %v2335_v7, 127  ;;  %v2435_v52 = vrot.slane %v2112_v49, %v2339_v9  ;;  %vm870_vm7 = vcmp.lt.s32.totalorder %v2335_v7, 113  ;;  %v2451_v59 = vrot.slane %v2112_v49, %v2337_v8 }
   0xe   : > { %s2169_s23 = sshll.u32 %s2691_s22, 3  ;;  %v2458_v61 = vrot.slane %v2117_v56, %v2339_v9  ;;  %vm976_vm8 = vcmp.lt.s32.totalorder %v2335_v7, 112  ;;  %v2474_v11 = vrot.slane %v2117_v56, %v2337_v8  ;;  %vm1082_vm9 = vcmp.lt.s32.totalorder %v2335_v7, 111 }
   0xf   : > { %s246_s26 = scalar_lea.vmem %s2683_s0, %s2169_s23 }
  0x10   : > { %v2294_v1 = vld [vmem:[%s246_s26] sm:$0xff] }
  0x11   : > { %256 = vrot.lane.b32.xlu1 %v2294_v1, %s2232_s27  ;;  %280 = vrot.lane.b32.xlu0 %v2294_v1, %s2233_s28  ;;  %v2302_v2 = vcombine.high %v2294_v1, %v2294_v1 }
  0x15   : > { %258 = vrot.lane.b32.xlu1 %v2302_v2, %s2232_s27  ;;  %282 = vrot.lane.b32.xlu0 %v2302_v2, %s2233_s28 }
  0x19   : > { %468 = vrot.lane.b32.xlu1 %v2302_v2, %s2234_s29  ;;  %466 = vrot.lane.b32.xlu0 %v2294_v1, %s2234_s29 }
  0x1d   : > { %574 = vrot.lane.b32.xlu1 %v2302_v2, %s2235_s30  ;;  %572 = vrot.lane.b32.xlu0 %v2294_v1, %s2235_s30 }
  0x21   : > { %762 = vrot.lane.b32.xlu1 %v2302_v2, %s2236_s7  ;;  %760 = vrot.lane.b32.xlu0 %v2294_v1, %s2236_s7 }
  0x25   : > { %868 = vrot.lane.b32.xlu1 %v2302_v2, %s2237_s8  ;;  %866 = vrot.lane.b32.xlu0 %v2294_v1, %s2237_s8 }
  0x29   : > { %974 = vrot.lane.b32.xlu1 %v2302_v2, %s2238_s9  ;;  %972 = vrot.lane.b32.xlu0 %v2294_v1, %s2238_s9 }
  0x2d   : > { %1080 = vrot.lane.b32.xlu1 %v2302_v2, %s2239_s10  ;;  %1078 = vrot.lane.b32.xlu0 %v2294_v1, %s2239_s10 }
  0x31   : > { %1187 = vperm.xlu0 %2221, %v1184_v3   ;;  %v2108_v3 = vld [vmem:[%s2685_s2 + $0x10] sm:$0xf] }
  0x83   : > { %v257_v12 = vpop.permute.xlu1 %256  ;;  %v281_v13 = vpop.permute.xlu0 %280 }
  0x87   : > { %v259_v19 = vpop.permute.xlu1 %258  ;;  %v283_v20 = vpop.permute.xlu0 %282 }
  0x88   : > { %v263_v21 = vsel %vm262_vm0, %v257_v12, %v259_v19  ;;  %v264_v22 = vsel %vm262_vm0, %v259_v19, %v257_v12  ;;  %v285_v23 = vsel %vm284_vm1, %v281_v13, %v283_v20  ;;  %v286_v24 = vsel %vm284_vm1, %v283_v20, %v281_v13  ;;  %v2113_v20 = vld [vmem:[%s2685_s2 + $0x14] sm:$0xf] }
  0x89   : > { %v278_v25 = vmul.f32 %v2349_v14, %v263_v21  ;;  %v300_v26 = vmul.f32 %v2353_v15, %v286_v24  ;;  %v301_v27 = vmul.f32 %v2356_v16, %v285_v23  ;;  %v277_v29 = vmul.f32 %v2359_v17, %v264_v22  ;;  %v2127_v22 = vld [vmem:[%s2684_s1 + $0x10] sm:$0x3] }
  0x8a   : > { %v2481_v13 = vrot.slane %v2122_v5, %v2339_v9 }
  0x8b   : > { %2092 = vmatprep.subr.msk.mxu0 %vm308_vm2, %v301_v27  ;;  %v469_v31 = vpop.permute.xlu1 %468  ;;  %v467_v32 = vpop.permute.xlu0 %466  ;;  %v2504_v27 = vrot.slane %v2127_v22, %v2339_v9 }
  0x8c   : > { %2093 = vmatpush1.msk.msra.mxu0 %vm308_vm2, %v300_v26  ;;  %v471_v33 = vsel %vm470_vm3, %v467_v32, %v469_v31  ;;  %v472_v37 = vsel %vm470_vm3, %v469_v31, %v467_v32  ;;  %v2118_v31 = vld [vmem:[%s2685_s2 + $0x18] sm:$0xf] }
  0x8d   : > { %2094 = vmatmul.mubr.msk.f32.vlgmr.msra.gmra.mrb[0].mxu0 %vm304_vm4, %v2091_v30  ;;  %2095 = vmatprep.subr.msk.mxu0 %vm308_vm2, %v278_v25  ;;  %v487_v35 = vmul.f32 %v2377_v28, %v471_v33  ;;  %v486_v42 = vmul.f32 %v2396_v36, %v472_v37  ;;  %v2497_v25 = vrot.slane %v2122_v5, %v2337_v8 }
  0x8e   : > { %2096 = vmatpush1.msk.msra.mxu0 %vm308_vm2, %v277_v29  ;;  %459 = vmatprep.mubr.f32.mxu0 %v2231_v0  ;;  %v2516_v33 = vrot.slane %v2127_v22, %v2337_v8  ;;  %v2128_v8 = vld [vmem:[%s2685_s2 + $0x20] sm:$0xf] }
  0x8f   : > { %2100 = vmatprep.subr.msk.mxu0 %vm308_vm2, %v487_v35  ;;  %v575_v38 = vpop.permute.xlu1 %574  ;;  %v573_v40 = vpop.permute.xlu0 %572  ;;  %v2123_v35 = vld [vmem:[%s2685_s2 + $0x1c] sm:$0xf] }
  0x90   : > { %v577_v41 = vsel %vm576_vm5, %v573_v40, %v575_v38  ;;  %v578_v46 = vsel %vm576_vm5, %v575_v38, %v573_v40 }
  0x91   : > { %v593_v44 = vmul.f32 %v2403_v39, %v577_v41  ;;  %v592_v47 = vmul.f32 %v2415_v45, %v578_v46  ;;  %v2009_v46 = vld [vmem:[%s2688_s5] sm:$0xf] }
  0x93   : > { %v763_v50 = vpop.permute.xlu1 %762  ;;  %v761_v51 = vpop.permute.xlu0 %760 }
  0x94   : > { %v766_v53 = vsel %vm764_vm6, %v763_v50, %v761_v51  ;;  %v765_v60 = vsel %vm764_vm6, %v761_v51, %v763_v50 }
  0x95   : > { %2097 = vmatmul.mubr.msk.f32.vlgmr.msra.gmra.mrb[0].mxu0 %vm304_vm4, %v279_v43  ;;  %v781_v55 = vmul.f32 %v2435_v52, %v766_v53  ;;  %v780_v63 = vmul.f32 %v2451_v59, %v765_v60 }
  0x96   : > { %2101 = vmatpush1.msk.msra.mxu0 %vm308_vm2, %v486_v42  ;;  %563 = vmatprep.mubr.f32.mxu0 %v2231_v0 }
  0x97   : > { %2105 = vmatprep.subr.msk.mxu0 %vm308_vm2, %v593_v44  ;;  %v869_v57 = vpop.permute.xlu1 %868  ;;  %v867_v58 = vpop.permute.xlu0 %866 }
  0x98   : > { %v872_v62 = vsel %vm870_vm7, %v869_v57, %v867_v58  ;;  %v871_v12 = vsel %vm870_vm7, %v867_v58, %v869_v57 }
  0x99   : > { %v887_v4 = vmul.f32 %v2458_v61, %v872_v62  ;;  %v886_v19 = vmul.f32 %v2474_v11, %v871_v12 }
  0x9b   : > { %v975_v6 = vpop.permute.xlu1 %974  ;;  %v973_v10 = vpop.permute.xlu0 %972 }
  0x9c   : > { %v978_v18 = vsel %vm976_vm8, %v975_v6, %v973_v10  ;;  %v977_v26 = vsel %vm976_vm8, %v973_v10, %v975_v6 }
  0x9d   : > { %2102 = vmatmul.mubr.msk.f32.vlgmr.msra.gmra.mrb[0].mxu0 %vm304_vm4, %v2099_v48  ;;  %v993_v21 = vmul.f32 %v2481_v13, %v978_v18  ;;  %v992_v30 = vmul.f32 %v2497_v25, %v977_v26 }
  0x9e   : > { %2106 = vmatpush1.msk.msra.mxu0 %vm308_vm2, %v592_v47  ;;  %669 = vmatprep.mubr.f32.mxu0 %v2231_v0 }
  0x9f   : > { %2109 = vmatprep.subr.msk.mxu0 %vm308_vm2, %v2302_v2  ;;  %v1081_v23 = vpop.permute.xlu1 %1080  ;;  %v1079_v24 = vpop.permute.xlu0 %1078 }
  0xa0   : > { %v1084_v29 = vsel %vm1082_vm9, %v1081_v23, %v1079_v24  ;;  %v1083_v9 = vsel %vm1082_vm9, %v1079_v24, %v1081_v23 }
  0xa1   : > { %v1099_v32 = vmul.f32 %v2504_v27, %v1084_v29  ;;  %v1098_v34 = vmul.f32 %v2516_v33, %v1083_v9 }
  0xa5   : > { %2107 = vmatmul.mubr.msk.f32.vlgmr.msra.gmra.mrb[0].mxu0 %vm304_vm4, %v2104_v54 }
  0xa6   : > { %2110 = vmatpush1.msk.msra.mxu0 %vm308_vm2, %v2294_v1  ;;  %751 = vmatprep.mubr.f32.mxu0 %v2231_v0 }
  0xa7   : > { %2114 = vmatprep.subr.msk.mxu0 %vm308_vm2, %v781_v55  ;;  %v2132_v55 = vld [vmem:[%s2687_s4 + $0x4] sm:$0xf] }
  0xad   : > { %2111 = vmatmul.mubr.msk.f32.vlgmr.msra.gmra.mrb[0].mxu0 %vm304_vm4, %v2108_v3 }
  0xae   : > { %2115 = vmatpush1.msk.msra.mxu0 %vm308_vm2, %v780_v63  ;;  %857 = vmatprep.mubr.f32.mxu0 %v2231_v0 }
  0xaf   : > { %2119 = vmatprep.subr.msk.mxu0 %vm308_vm2, %v887_v4 }
  0xb0   : > { %v1188_v37 = vpop.permute.xlu0 %1187 }
  0xb5   : > { %2116 = vmatmul.mubr.msk.f32.vlgmr.msra.gmra.mrb[0].mxu0 %vm304_vm4, %v2113_v20 }
  0xb6   : > { %2120 = vmatpush1.msk.msra.mxu0 %vm308_vm2, %v886_v19  ;;  %963 = vmatprep.mubr.f32.mxu0 %v2231_v0 }
  0xb7   : > { %2124 = vmatprep.subr.msk.mxu0 %vm308_vm2, %v993_v21  ;;  %v2143_v21 = vld [vmem:[%s2687_s4 + $0xc] sm:$0xf] }
  0xbd   : > { %2121 = vmatmul.mubr.msk.f32.vlgmr.msra.gmra.mrb[0].mxu0 %vm304_vm4, %v2118_v31 }
  0xbe   : > { %2125 = vmatpush1.msk.msra.mxu0 %vm308_vm2, %v992_v30  ;;  %1069 = vmatprep.mubr.f32.mxu0 %v2231_v0 }
  0xbf   : > { %2129 = vmatprep.subr.msk.mxu0 %vm308_vm2, %v1099_v32 }
  0xc5   : > { %2126 = vmatmul.mubr.msk.f32.vlgmr.msra.gmra.mrb[0].mxu0 %vm304_vm4, %v2123_v35 }
  0xc6   : > { %2130 = vmatpush1.msk.msra.mxu0 %vm308_vm2, %v1098_v34  ;;  %1175 = vmatprep.mubr.f32.mxu0 %v2231_v0 }
  0xcd   : > { %2131 = vmatmul.mubr.msk.f32.vlgmr.msra.gmra.mrb[0].mxu0 %vm304_vm4, %v2128_v8 }
 0x1a0   : > { %v1177_v38 = vpop.f32.mrb[0].mxu0 }
 0x1a1   : > { %v1190_v40 = vadd.f32 %v1188_v37, %v1177_v38  ;;  %v1179_v41 = vpop.f32.mrb[1].mxu0 }
 0x1a2   : > { %v1191_v43 = vadd.f32 %v1188_v37, %v1179_v41 }
 0x1a3   : > { %v2533_v42 = vmax.f32 %v1190_v40, 0.0 }
 0x1a4   : > { %v1193_v44 = vmax.f32 %v1191_v43, 0.0  ;;  %v2159_v43 = vld [vmem:[%s2687_s4 + $0x1c] sm:$0xf] }
 0x1a5   : > { %1194 = vrot.lane.b32.xlu0 %v2533_v42, %s2232_s27  ;;  %1203 = vrot.lane.b32.xlu1 %v2533_v42, %s2233_s28 }
 0x1a9   : > { %1373 = vrot.lane.b32.xlu0 %v2533_v42, %s2234_s29  ;;  %1205 = vrot.lane.b32.xlu1 %v1193_v44, %s2233_s28  ;;  %s251_s28 = scalar_lea.vmem %s2689_s6, %s2169_s23 }
 0x1ad   : > { %1465 = vrot.lane.b32.xlu0 %v2533_v42, %s2235_s30  ;;  %1196 = vrot.lane.b32.xlu1 %v1193_v44, %s2232_s27 }
 0x1b1   : > { %1641 = vrot.lane.b32.xlu0 %v2533_v42, %s2236_s7  ;;  %1375 = vrot.lane.b32.xlu1 %v1193_v44, %s2234_s29 }
 0x1b5   : > { %1733 = vrot.lane.b32.xlu0 %v2533_v42, %s2237_s8  ;;  %1467 = vrot.lane.b32.xlu1 %v1193_v44, %s2235_s30 }
 0x1b9   : > { %1825 = vrot.lane.b32.xlu0 %v2533_v42, %s2238_s9  ;;  %1643 = vrot.lane.b32.xlu1 %v1193_v44, %s2236_s7 }
 0x1bd   : > { %1917 = vrot.lane.b32.xlu0 %v2533_v42, %s2239_s10  ;;  %1735 = vrot.lane.b32.xlu1 %v1193_v44, %s2237_s8 }
 0x1c1   : > { %2012 = vperm.xlu0 %2221, %v2009_v46   ;;  %1827 = vrot.lane.b32.xlu1 %v1193_v44, %s2238_s9 }
 0x1c5   : > { %1919 = vrot.lane.b32.xlu1 %v1193_v44, %s2239_s10 }
 0x217   : > { %v1204_v47 = vpop.permute.xlu1 %1203  ;;  %v1195_v48 = vpop.permute.xlu0 %1194 }
 0x21b   : > { %v1206_v49 = vpop.permute.xlu1 %1205  ;;  %v1374_v60 = vpop.permute.xlu0 %1373 }
 0x21c   : > { %v1207_v50 = vsel %vm284_vm1, %v1204_v47, %v1206_v49  ;;  %v1208_v51 = vsel %vm284_vm1, %v1206_v49, %v1204_v47 }
 0x21d   : > { %v1209_v53 = vmul.f32 %v1208_v51, %v2353_v15  ;;  %v1210_v54 = vmul.f32 %v1207_v50, %v2356_v16 }
 0x21f   : > { %2133 = vmatprep.subr.msk.mxu1 %vm308_vm2, %v1210_v54  ;;  %v1197_v56 = vpop.permute.xlu1 %1196 }
 0x220   : > { %v1198_v57 = vsel %vm262_vm0, %v1195_v48, %v1197_v56  ;;  %v1199_v58 = vsel %vm262_vm0, %v1197_v56, %v1195_v48  ;;  %2134 = vmatpush1.msk.msra.mxu1 %vm308_vm2, %v1209_v53 }
 0x221   : > { %v1200_v15 = vmul.f32 %v1199_v58, %v2359_v17  ;;  %v1201_v16 = vmul.f32 %v1198_v57, %v2349_v14  ;;  %2135 = vmatmul.mubr.msk.f32.vlgmr.msra.gmra.mrb[0].mxu1 %vm304_vm4, %v2132_v55  ;;  %v1202_v14 = vld [vmem:[%s2687_s4] sm:$0xf]  ;;  %v1466_v17 = vpop.permute.xlu0 %1465 }
 0x222   : > { %1366 = vmatprep.mubr.f32.mxu1 %v2231_v0 }
 0x223   : > { %2136 = vmatprep.subr.msk.mxu1 %vm308_vm2, %v1201_v16  ;;  %v1376_v62 = vpop.permute.xlu1 %1375 }
 0x224   : > { %v1377_v63 = vsel %vm470_vm3, %v1374_v60, %v1376_v62  ;;  %2137 = vmatpush1.msk.msra.mxu1 %vm308_vm2, %v1200_v15  ;;  %v1378_v3 = vsel %vm470_vm3, %v1376_v62, %v1374_v60 }
 0x225   : > { %v1380_v4 = vmul.f32 %v1377_v63, %v2377_v28  ;;  %v1379_v6 = vmul.f32 %v1378_v3, %v2396_v36  ;;  %v2139_v36 = vld [vmem:[%s2687_s4 + $0x8] sm:$0xf]  ;;  %v1642_v19 = vpop.permute.xlu0 %1641 }
 0x227   : > { %2140 = vmatprep.subr.msk.mxu1 %vm308_vm2, %v1380_v4  ;;  %v1468_v5 = vpop.permute.xlu1 %1467 }
 0x228   : > { %v1469_v10 = vsel %vm576_vm5, %v1466_v17, %v1468_v5  ;;  %v1470_v28 = vsel %vm576_vm5, %v1468_v5, %v1466_v17 }
 0x229   : > { %v1472_v12 = vmul.f32 %v1469_v10, %v2403_v39  ;;  %2138 = vmatmul.mubr.msk.f32.vlgmr.msra.gmra.mrb[0].mxu1 %vm304_vm4, %v1202_v14  ;;  %v1471_v18 = vmul.f32 %v1470_v28, %v2415_v45  ;;  %v1734_v23 = vpop.permute.xlu0 %1733 }
 0x22a   : > { %2141 = vmatpush1.msk.msra.mxu1 %vm308_vm2, %v1379_v6  ;;  %1456 = vmatprep.mubr.f32.mxu1 %v2231_v0 }
 0x22b   : > { %2144 = vmatprep.subr.msk.mxu1 %vm308_vm2, %v1472_v12  ;;  %v1644_v39 = vpop.permute.xlu1 %1643 }
 0x22c   : > { %v1646_v20 = vsel %vm764_vm6, %v1644_v39, %v1642_v19  ;;  %v1645_v24 = vsel %vm764_vm6, %v1642_v19, %v1644_v39 }
 0x22d   : > { %v1648_v22 = vmul.f32 %v1646_v20, %v2435_v52  ;;  %v2147_v52 = vld [vmem:[%s2687_s4 + $0x10] sm:$0xf]  ;;  %v1647_v29 = vmul.f32 %v1645_v24, %v2451_v59  ;;  %v1826_v32 = vpop.permute.xlu0 %1825  ;;  %v2151_v59 = vld [vmem:[%s2687_s4 + $0x14] sm:$0xf] }
 0x22f   : > { %v1736_v45 = vpop.permute.xlu1 %1735 }
 0x230   : > { %v1738_v26 = vsel %vm870_vm7, %v1736_v45, %v1734_v23  ;;  %v1737_v9 = vsel %vm870_vm7, %v1734_v23, %v1736_v45 }
 0x231   : > { %2142 = vmatmul.mubr.msk.f32.vlgmr.msra.gmra.mrb[0].mxu1 %vm304_vm4, %v2139_v36  ;;  %v1740_v30 = vmul.f32 %v1738_v26, %v2458_v61  ;;  %v1739_v61 = vmul.f32 %v1737_v9, %v2474_v11  ;;  %v1918_v37 = vpop.permute.xlu0 %1917  ;;  %v2155_v11 = vld [vmem:[%s2687_s4 + $0x18] sm:$0xf] }
 0x232   : > { %2145 = vmatpush1.msk.msra.mxu1 %vm308_vm2, %v1471_v18  ;;  %1548 = vmatprep.mubr.f32.mxu1 %v2231_v0 }
 0x233   : > { %2148 = vmatprep.subr.msk.mxu1 %vm308_vm2, %v1193_v44  ;;  %v1828_v31 = vpop.permute.xlu1 %1827 }
 0x234   : > { %v1830_v34 = vsel %vm976_vm8, %v1828_v31, %v1826_v32  ;;  %v1829_v38 = vsel %vm976_vm8, %v1826_v32, %v1828_v31 }
 0x235   : > { %v1832_v35 = vmul.f32 %v1830_v34, %v2481_v13  ;;  %v1831_v13 = vmul.f32 %v1829_v38, %v2497_v25 }
 0x237   : > { %v1920_v8 = vpop.permute.xlu1 %1919 }
 0x238   : > { %v1922_v40 = vsel %vm1082_vm9, %v1920_v8, %v1918_v37 }
 0x239   : > { %2146 = vmatmul.mubr.msk.f32.vlgmr.msra.gmra.mrb[0].mxu1 %vm304_vm4, %v2143_v21  ;;  %v1924_v41 = vmul.f32 %v1922_v40, %v2504_v27  ;;  %v2163_v27 = vld [vmem:[%s2687_s4 + $0x20] sm:$0xf] }
 0x23a   : > { %2149 = vmatpush1.msk.msra.mxu1 %vm308_vm2, %v2533_v42  ;;  %1632 = vmatprep.mubr.f32.mxu1 %v2231_v0  ;;  %v1921_v42 = vsel %vm1082_vm9, %v1918_v37, %v1920_v8 }
 0x23b   : > { %2152 = vmatprep.subr.msk.mxu1 %vm308_vm2, %v1648_v22  ;;  %v1923_v25 = vmul.f32 %v1921_v42, %v2516_v33 }
 0x240   : > { %v2013_v7 = vpop.permute.xlu0 %2012 }
 0x241   : > { %2150 = vmatmul.mubr.msk.f32.vlgmr.msra.gmra.mrb[0].mxu1 %vm304_vm4, %v2147_v52 }
 0x242   : > { %2153 = vmatpush1.msk.msra.mxu1 %vm308_vm2, %v1647_v29  ;;  %1724 = vmatprep.mubr.f32.mxu1 %v2231_v0 }
 0x243   : > { %2156 = vmatprep.subr.msk.mxu1 %vm308_vm2, %v1740_v30 }
 0x249   : > { %2154 = vmatmul.mubr.msk.f32.vlgmr.msra.gmra.mrb[0].mxu1 %vm304_vm4, %v2151_v59 }
 0x24a   : > { %2157 = vmatpush1.msk.msra.mxu1 %vm308_vm2, %v1739_v61  ;;  %1816 = vmatprep.mubr.f32.mxu1 %v2231_v0 }
 0x24b   : > { %2160 = vmatprep.subr.msk.mxu1 %vm308_vm2, %v1832_v35 }
 0x251   : > { %2158 = vmatmul.mubr.msk.f32.vlgmr.msra.gmra.mrb[0].mxu1 %vm304_vm4, %v2155_v11 }
 0x252   : > { %2161 = vmatpush1.msk.msra.mxu1 %vm308_vm2, %v1831_v13  ;;  %1908 = vmatprep.mubr.f32.mxu1 %v2231_v0 }
 0x253   : > { %2164 = vmatprep.subr.msk.mxu1 %vm308_vm2, %v1924_v41 }
 0x259   : > { %2162 = vmatmul.mubr.msk.f32.vlgmr.msra.gmra.mrb[0].mxu1 %vm304_vm4, %v2159_v43 }
 0x25a   : > { %2165 = vmatpush1.msk.msra.mxu1 %vm308_vm2, %v1923_v25  ;;  %2000 = vmatprep.mubr.f32.mxu1 %v2231_v0 }
 0x261   : > { %2166 = vmatmul.mubr.msk.f32.vlgmr.msra.gmra.mrb[0].mxu1 %vm304_vm4, %v2163_v27 }
 0x334   : > { %v2002_v44 = vpop.f32.mrb[0].mxu1 }
 0x335   : > { %v2015_v46 = vadd.f32 %v2013_v7, %v2002_v44  ;;  %v2004_v47 = vpop.f32.mrb[1].mxu1 }
 0x336   : > { %v2016_v48 = vadd.f32 %v2013_v7, %v2004_v47 }
 0x337   : > { %v2017_v49 = vadd.f32 %v2015_v46, %v2294_v1 }
 0x338   : > { %v2018_v33 = vadd.f32 %v2016_v48, %v2302_v2 }
 0x339   : > { %v2019_v50 = vmax.f32 %v2017_v49, 0.0 }
 0x33a   : > { %v2020_v51 = vmax.f32 %v2018_v33, 0.0 }
 0x33c   : > { %v2023_v0 = vcombine.low %v2019_v50, %v2020_v51 }
 0x33e   : > { %2025 = vst [vmem:[%s251_s28] sm:$0xff] %v2023_v0 }
 0x33f PF: > { %s16_s21 = sadd.s32 1, %s2229_s21  }
 0x340   : > { %p13_p4 = scmp.ge.s32.totalorder %s16_s21, 4  }
 0x342   :  { %15 = sbr.rel (!%p13_p4) target bundleno = 1 (0x1), region = 97 }

</bundles_post_ra>
